<compile_context>
chip_gen: v7x
topology: tpu7x:2x2x1
jax: 0.10.0
libtpu: 0.0.40
codegen_flags: <defaults>
</compile_context>

<pallas_src>
import functools

import jax
import jax.numpy as jnp
import numpy as np
from jax import lax
from jax.experimental import pallas as pl
from jax.experimental.pallas import tpu as pltpu

# F.normalize uses x / max(norm, eps) with eps=1e-12.  Since sqrt is monotone,
# 1 / max(sqrt(ss), eps) == rsqrt(max(ss, eps^2)).
_EPS_SQ = 1e-24


def _round_up(x, m):
    return (x + m - 1) // m * m


def _wnorm_kernel(w_ref, out_ref):
    """Column-wise (dim=0) L2-normalize W. Runs once, hoisted out of the N loop."""
    w = w_ref[...].astype(jnp.float32)                      # (D, TC)
    sumsq = jnp.sum(w * w, axis=0, keepdims=True)           # (1, TC)
    out_ref[...] = w * lax.rsqrt(jnp.maximum(sumsq, jnp.float32(_EPS_SQ)))


def _arc_kernel(feat_ref, wn_ref, out_ref, *, m, s):
    """Per-N-tile body: row-normalize -> MXU matmul -> fused elementwise tail."""
    x = feat_ref[...].astype(jnp.float32)                   # (TN, D)
    wn = wn_ref[...].astype(jnp.float32)                    # (D, C), pre-normalized

    # Row-normalize x and fold the fixed /10 cosine scale into the SMALL (TN, D)
    # operand rather than scaling the (TN, C) matmul result.
    sumsq = jnp.sum(x * x, axis=1, keepdims=True)            # (TN, 1)
    inv_norm = lax.rsqrt(jnp.maximum(sumsq, jnp.float32(_EPS_SQ)))
    x_s = x * (inv_norm * jnp.float32(0.1))                  # normalize(x) / 10

    # cos == (normalize(x) @ normalize(W)) / 10, straight off the MXU.
    cos = jnp.dot(x_s, wn, preferred_element_type=jnp.float32)   # (TN, C)

    # a = acos(cos); cos(a) = cos; sin(a) = sqrt(1 - cos^2) since a in [0, pi].
    sin_a = jnp.sqrt(jnp.maximum(1.0 - cos * cos, 0.0))
    # log(top) = s*cos(a + m), with (s cos m) / (s sin m) pre-folded scalars.
    log_top = jnp.float32(s * np.cos(m)) * cos - jnp.float32(s * np.sin(m)) * sin_a

    exp_s_cos = jnp.exp(jnp.float32(s) * cos)                 # exp(s * cos(a))
    row_sum = jnp.sum(exp_s_cos, axis=1, keepdims=True)       # (TN, 1)

    # out = log(top / (top + down2)) = log_top - log(row_sum - exp_s_cos + top)
    out_ref[...] = log_top - jnp.log(row_sum - exp_s_cos + jnp.exp(log_top))


def arc_forward(feature, W, m=1.0, s=10.0, *, block_n=256, block_c=512):
    """Pallas implementation of Arc.forward(feature, m, s)."""
    N, D = feature.shape
    D2, C = W.shape
    assert D == D2

    # ---- 1) Normalize W columns once (hoisted; W is a parameter). ----------
    tc = min(block_c, C)
    if C % tc != 0 or tc % 128 != 0:
        tc = C                                              # full-width block is always legal
    w_n = pl.pallas_call(
        _wnorm_kernel,
        out_shape=jax.ShapeDtypeStruct((D, C), jnp.float32),
        grid=(C // tc,),
        in_specs=[pl.BlockSpec((D, tc), lambda j: (0, j))],
        out_specs=pl.BlockSpec((D, tc), lambda j: (0, j)),
        compiler_params=pltpu.CompilerParams(dimension_semantics=("parallel",)),
    )(W)

    # ---- 2) Main kernel, gridded over the batch axis. ----------------------
    # Tile/pad N to a multiple of 8 (sublane granule).
    tn = min(block_n, _round_up(N, 8))

    # VMEM budget (f32, double-buffered feature/output tiles + resident W).
    # Keep under ~40 MiB so it fits v7x's 64 MiB physical VMEM with headroom
    # (v5e/v6e have 128 MiB so this is conservative there).
    def _vmem_bytes(tn_):
        return 4 * (2 * tn_ * D + 2 * tn_ * C + D * C)

    while tn > 8 and _vmem_bytes(tn) > (40 << 20):
        tn = max(8, tn // 2)

    n_pad = _round_up(N, tn)
    feat_p = feature if n_pad == N else jnp.pad(feature, ((0, n_pad - N), (0, 0)))

    kernel = functools.partial(_arc_kernel, m=float(m), s=float(s))
    out = pl.pallas_call(
        kernel,
        out_shape=jax.ShapeDtypeStruct((n_pad, C), jnp.float32),
        grid=(n_pad // tn,),
        in_specs=[
            pl.BlockSpec((tn, D), lambda i: (i, 0)),        # feature tile (pipelined)
            pl.BlockSpec((D, C), lambda i: (0, 0)),         # normalized W, resident
        ],
        out_specs=pl.BlockSpec((tn, C), lambda i: (i, 0)),
        compiler_params=pltpu.CompilerParams(
            dimension_semantics=("parallel",),              # megacore-shardable batch axis
            vmem_limit_bytes=48 << 20,
        ),
    )(feat_p, w_n)

    return out if n_pad == N else out[:N]


def arc_reference(feature, W, m=1.0, s=10.0):
    """Pure-JAX reference mirroring the PyTorch code (including acos)."""
    x = feature / jnp.maximum(jnp.linalg.norm(feature, axis=1, keepdims=True), 1e-12)
    w = W / jnp.maximum(jnp.linalg.norm(W, axis=0, keepdims=True), 1e-12)
    cos = jnp.matmul(x, w) / 10.0
    a = jnp.arccos(cos)
    top = jnp.exp(s * jnp.cos(a + m))
    exp_s_cos = jnp.exp(s * jnp.cos(a))
    down2 = jnp.sum(exp_s_cos, axis=1, keepdims=True) - exp_s_cos
    return jnp.log(top / (top + down2))


if __name__ == "__main__":
    # Small shapes consistent with the module: batch=8, feature_dim=32, cls_dim=128.
    N = 8
    feature_dim = 32
    cls_dim = 128

    key = jax.random.PRNGKey(0)
    k_feat, k_w = jax.random.split(key)

    W = jax.random.normal(k_w, (feature_dim, cls_dim), dtype=jnp.float32)
    feature = jax.random.normal(k_feat, (N, feature_dim), dtype=jnp.float32)

    out = arc_forward(feature, W, m=1.0, s=10.0)
    out = jax.block_until_ready(out)

    ref = arc_reference(feature, W, m=1.0, s=10.0)
    np.testing.assert_allclose(np.asarray(out), np.asarray(ref), rtol=1e-5, atol=5e-5)

    print("KERNEL_OK")
</pallas_src>

<mosaic_0001>
module attributes {stable_mosaic.version = 11 : i64} {
  func.func @_wnorm_kernel(%arg0: i32, %arg1: memref<32x128xf32, #tpu.memory_space<vmem>>, %arg2: memref<32x128xf32, #tpu.memory_space<vmem>>) attributes {dimension_semantics = [#tpu.dimension_semantics<parallel>], iteration_bounds = array<i64: 1>, scalar_prefetch = 0 : i64, scratch_operands = 0 : i64, tpu.core_type = #tpu.core_type<tc>, window_params = [{transform_indices = @transform_0, window_bounds = array<i64: 32, 128>}, {transform_indices = @transform_1, window_bounds = array<i64: 32, 128>}]} {
    %c0 = arith.constant 0 : index
    %c0_0 = arith.constant 0 : index
    %0 = vector.load %arg1[%c0, %c0_0] : memref<32x128xf32, #tpu.memory_space<vmem>>, vector<32x128xf32>
    %1 = arith.mulf %0, %0 : vector<32x128xf32>
    %cst = arith.constant dense<0.000000e+00> : vector<128xf32>
    %2 = vector.multi_reduction <add>, %1, %cst [0] : vector<32x128xf32> to vector<128xf32>
    %3 = vector.shape_cast %2 : vector<128xf32> to vector<1x128xf32>
    %cst_1 = arith.constant 1.000000e-24 : f32
    %4 = vector.broadcast %cst_1 : f32 to vector<1x128xf32>
    %5 = arith.maximumf %3, %4 : vector<1x128xf32>
    %6 = math.rsqrt %5 : vector<1x128xf32>
    %7 = vector.broadcast %6 : vector<1x128xf32> to vector<32x128xf32>
    %8 = arith.mulf %0, %7 : vector<32x128xf32>
    %c0_2 = arith.constant 0 : index
    %c0_3 = arith.constant 0 : index
    %9 = vector.load %arg2[%c0_2, %c0_3] : memref<32x128xf32, #tpu.memory_space<vmem>>, vector<32x128xf32>
    tpu.vector_store %arg2[%c0_2, %c0_3], %8 {strides = array<i32>} : memref<32x128xf32, #tpu.memory_space<vmem>>, vector<32x128xf32>,
    return
  }
  func.func @transform_0(%arg0: i32) -> (i32, i32) {
    %c0_i32 = arith.constant 0 : i32
    %c0_i32_0 = arith.constant 0 : i32
    return %c0_i32, %arg0 : i32, i32
  }
  func.func @transform_1(%arg0: i32) -> (i32, i32) {
    %c0_i32 = arith.constant 0 : i32
    %c0_i32_0 = arith.constant 0 : i32
    return %c0_i32, %arg0 : i32, i32
  }
}

</mosaic_0001>

<bundles_post_ra>
// kernel: tpu_custom_call.1
= control target key start
LH: loop header
LB: loop body
LE: loop exit
PB: predicated region body
PF: predicated region fallthrough
CT: control target
= control target key end

     0   :  { %6 = vsyncpa [#allocation3], 0  ;;  %s165_s0 = inlined_call_operand.hbm [shape: f32[32,128], index: 0, kind: input, shape index: {}]   ;;  %s166_s1 = inlined_call_operand.hbm [shape: f32[32,128], index: 1, kind: output, shape index: {}]  }
   0x1   :  { %7 = vsyncpa [#allocation4], 0  ;;  %s121_s6 = smov [#allocation2]   ;;  %s73_s10 = scalar_lea.hbm %s165_s0, 512 }
   0x2   :  { %s13_s7 = sshll.u32 %s121_s6, 4  ;;  %p74_p0 = scmp.ne.s32.totalorder %s165_s0, %s73_s10  ;;  %s14_s7 = int_to_ptr.vmem [resolvable:$true] %s13_s7 }
   0x3   :  { %p77_p1 = scmp.lt.u32.totalorder %s73_s10, %s165_s0 }
   0x5   :  { %p79_p2 = pnand %p77_p1, %p74_p0 }
   0x7   :  { %82 = shalt.err (!%p79_p2)
}
   0x8   :  { %s83_s15 = scalar_lea.vmem %s14_s7, 512  ;;  %p88_p4 = scmp.lt.s32.totalorder %s14_s7, %s14_s7 }
   0x9   :  { %p84_p3 = scmp.ne.s32.totalorder %s14_s7, %s83_s15  ;;  %p89_p5 = scmp.lt.s32.totalorder %s83_s15, %s83_s15 }
   0xb   :  { %p90_p6 = por %p89_p5, %p88_p4 }
   0xd   :  { %p91_p7 = pnand %p90_p6, %p84_p3 }
   0xf   :  { %94 = shalt.err (!%p91_p7)
}
  0x10   :  { %s122_s16 = smov 128   ;;  %s123_s17 = smov 8  }
  0x11   :  { %19 = dma.hbm_to_vmem [thread:$0]  %s165_s0, 512, %s14_s7, [#allocation3], %s122_s16, %s122_s16, %s123_s17  }
  0x12   :  { %117 = dma.done.wait [#allocation3], 512  }
  0x13   :  { %118 = vsyncadd [#allocation3], 4294966784  ;;  %v23_v0 = vld [vmem:[#allocation2] sm:$0xff]  ;;  %v24_v1 = vld [vmem:[#allocation2 + $0x8] sm:$0xff]  ;;  %s124_s0 = smov [#allocation5]  }
  0x14   :  { %v25_v2 = vld [vmem:[#allocation2 + $0x10] sm:$0xff]  ;;  %v26_v3 = vld [vmem:[#allocation2 + $0x18] sm:$0xff]  ;;  %v27_v4 = vmul.f32 %v23_v0, %v23_v0  ;;  %v28_v5 = vmul.f32 %v24_v1, %v24_v1  ;;  %s55_s20 = sshll.u32 %s124_s0, 4  ;;  %s56_s20 = int_to_ptr.vmem [resolvable:$true] %s55_s20 }
  0x15   :  { %v29_v6 = vmul.f32 %v25_v2, %v25_v2  ;;  %v30_v7 = vmul.f32 %v26_v3, %v26_v3  ;;  %s95_s21 = scalar_lea.vmem %s56_s20, 512  ;;  %p100_p9 = scmp.lt.s32.totalorder %s56_s20, %s56_s20 }
  0x16   :  { %v31_v8 = vadd.f32 %v28_v5, %v27_v4  ;;  %p96_p8 = scmp.ne.s32.totalorder %s56_s20, %s95_s21  ;;  %p101_p10 = scmp.lt.s32.totalorder %s95_s21, %s95_s21 }
  0x18   :  { %v32_v9 = vadd.f32 %v31_v8, %v29_v6  ;;  %p102_p11 = por %p101_p10, %p100_p9 }
  0x1a   :  { %v33_v10 = vadd.f32 %v32_v9, %v30_v7  ;;  %p103_p12 = pnand %p102_p11, %p96_p8 }
  0x1c   :  { %v34_v11 = vrot.slane %v33_v10, 4 }
  0x1e   :  { %v35_v12 = vadd.f32 %v34_v11, %v33_v10 }
  0x20   :  { %v36_v13 = vrot.slane %v35_v12, 2 }
  0x22   :  { %v37_v14 = vadd.f32 %v36_v13, %v35_v12 }
  0x24   :  { %v38_v15 = vrot.slane %v37_v14, 1 }
  0x26   :  { %v39_v16 = vadd.f32 %v38_v15, %v37_v14 }
  0x28   :  { %v40_v17 = vmax.f32 %v39_v16, 1e-24 }
  0x2a   :  { %71 = vrsqrt.f32 %v40_v17 }
  0x34   :  { %v72_v18 = vpop.eup %71 }
  0x35   :  { %v42_v19 = vmul.f32 %v72_v18, %v23_v0  ;;  %v43_v20 = vmul.f32 %v72_v18, %v24_v1  ;;  %v44_v21 = vmul.f32 %v72_v18, %v25_v2  ;;  %v45_v22 = vmul.f32 %v72_v18, %v26_v3 }
  0x37   :  { %46 = vst [vmem:[#allocation5] sm:$0xff] %v42_v19  ;;  %47 = vst [vmem:[#allocation5 + $0x8] sm:$0xff] %v43_v20 }
  0x38   :  { %48 = vst [vmem:[#allocation5 + $0x10] sm:$0xff] %v44_v21  ;;  %49 = vst [vmem:[#allocation5 + $0x18] sm:$0xff] %v45_v22 }
  0x39   :  { %106 = shalt.err (!%p103_p12)
}
  0x3a   :  { %s107_s24 = scalar_lea.hbm %s166_s1, 512 }
  0x3b   :  { %p108_p13 = scmp.ne.s32.totalorder %s166_s1, %s107_s24  ;;  %p111_p0 = scmp.lt.u32.totalorder %s107_s24, %s166_s1 }
  0x3d   :  { %p113_p1 = pnand %p111_p0, %p108_p13 }
  0x3f   :  { %116 = shalt.err (!%p113_p1)
}
  0x40   :  { %61 = dma.vmem_to_hbm [thread:$0]  %s56_s20, 512, %s166_s1, [#allocation4], %s122_s16, %s122_s16, %s123_s17  }
  0x41   :  { %119 = dma.done.wait [#allocation4], 512  }
  0x42   :  { %120 = vsyncadd [#allocation4], 4294966784 }
  0x43   :  { %65 = vsyncpa [#allocation3], 1 }
  0x44   :  { %66 = vsyncpa [#allocation4], 1 }

</bundles_post_ra>
